<compile_context>
chip_gen: v5e
topology: v5e:2x2
jax: 0.10.0
libtpu: 0.0.40
codegen_flags: <defaults>
</compile_context>

<pallas_src>
import jax
import jax.numpy as jnp
from jax.experimental import pallas as pl
from jax.experimental.pallas import tpu as pltpu

SEQ = 2
HID = 32
NF = 4 * HID + 128          # fused (whh || wlin_t0) width, zero-padded to a lane multiple


def _round_up(n, m):
    return ((n + m - 1) // m) * m


def lstm_linear_kernel(x_ref, wih_ref, b_ref, whhf_ref, wlin1_ref, blin_ref, out_ref):
    """One batch tile: SEQ=2 LSTM recurrence fully unrolled, Linear fused in."""
    x = x_ref[...]            # (TB, SEQ)
    wih = wih_ref[...]        # (1, 4H)   i/f/o columns pre-scaled by 0.5
    b = b_ref[...]            # (1, 4H)   i/f/o columns pre-scaled by 0.5
    whhf = whhf_ref[...]      # (H, NF)   fused recurrent + Linear(t=0) weights
    wlin1 = wlin1_ref[...]    # (H, 2)

    # Per-lane affine constants finishing the single-tanh activation:
    #   i/f/o lanes: sigmoid(z) = 0.5*tanh(0.5*z) + 0.5   (0.5 folded into weights)
    #   g lanes:     tanh(z)
    lane = jax.lax.broadcasted_iota(jnp.int32, (1, 4 * HID), 1)
    is_g = jnp.logical_and(lane >= 2 * HID, lane < 3 * HID)
    mult = jnp.where(is_g, 1.0, 0.5).astype(jnp.float32)
    add = jnp.where(is_g, 0.0, 0.5).astype(jnp.float32)

    # ---- t = 0 : h = c = 0, so no recurrent matmul and no f*c term. ----
    acts0 = jnp.tanh(x[:, 0:1] * wih + b) * mult + add         # [ i | f | g | o ]
    i0 = acts0[:, 0 * HID:1 * HID]
    g0 = acts0[:, 2 * HID:3 * HID]
    o0 = acts0[:, 3 * HID:4 * HID]
    c0 = i0 * g0
    h0 = o0 * jnp.tanh(c0)

    # ---- t = 1 : one fused matmul yields the gates AND h0's Linear contribution. ----
    res = jnp.dot(h0, whhf, preferred_element_type=jnp.float32)       # (TB, NF)
    acts1 = jnp.tanh(x[:, 1:2] * wih + res[:, 0:4 * HID] + b) * mult + add
    i1 = acts1[:, 0 * HID:1 * HID]
    f1 = acts1[:, 1 * HID:2 * HID]
    g1 = acts1[:, 2 * HID:3 * HID]
    o1 = acts1[:, 3 * HID:4 * HID]
    c1 = f1 * c0 + i1 * g1
    h1 = o1 * jnp.tanh(c1)

    out0 = res[:, 4 * HID:4 * HID + 2]                                # h0 @ wlin[:H]
    # NOTE: (TB, 2) store is lane-masked; kept as-is per review (8 B/row, off critical path).
    out_ref[...] = (
        out0
        + jnp.dot(h1, wlin1, preferred_element_type=jnp.float32)
        + blin_ref[...]
    )


def net_forward(x, kparams, *, batch_tile=2048):
    """x: (B, SEQ, 1) float32. Returns (B, 2) float32."""
    B = x.shape[0]
    x2d = x.reshape(B, SEQ).astype(jnp.float32)   # squeeze input_size=1
    wih_pre, bias_pre, whh_fused, wlin1, b_lin = kparams

    # Aim for >= 2 grid steps (keeps both v7x TensorCores busy under
    # dimension_semantics=("parallel",)) while keeping the tile a multiple of
    # 8 sublanes and capped at batch_tile (<= 2048: comfortably inside v7x's
    # 64 MiB VMEM as well as v5e/v6e's 128 MiB).
    half = _round_up(max(1, -(-B // 2)), 8)
    tb = _round_up(min(batch_tile, half), 8)
    b_pad = _round_up(B, tb)
    if b_pad != B:
        x2d = jnp.pad(x2d, ((0, b_pad - B), (0, 0)))  # zero-padded tail rows (sliced off)
    grid = (b_pad // tb,)

    out = pl.pallas_call(
        lstm_linear_kernel,
        out_shape=jax.ShapeDtypeStruct((b_pad, 2), jnp.float32),
        grid_spec=pltpu.PrefetchScalarGridSpec(
            num_scalar_prefetch=0,
            grid=grid,
            in_specs=[
                pl.BlockSpec((tb, SEQ), lambda i: (i, 0)),          # x tile
                pl.BlockSpec((1, 4 * HID), lambda i: (0, 0)),       # wih_pre   (resident)
                pl.BlockSpec((1, 4 * HID), lambda i: (0, 0)),       # bias_pre  (resident)
                pl.BlockSpec((HID, NF), lambda i: (0, 0)),          # whh_fused (resident)
                pl.BlockSpec((HID, 2), lambda i: (0, 0)),           # wlin1     (resident)
                pl.BlockSpec((1, 2), lambda i: (0, 0)),             # b_lin     (resident)
            ],
            out_specs=pl.BlockSpec((tb, 2), lambda i: (i, 0)),
        ),
        compiler_params=pltpu.CompilerParams(
            dimension_semantics=("parallel",),
            vmem_limit_bytes=32 * 1024 * 1024,
        ),
    )(x2d, wih_pre, bias_pre, whh_fused, wlin1, b_lin)
    return out[:B]


def prepare_kernel_params(raw):
    """Fold sigmoid pre-scale and Linear(t=0) fusion into the weights (exact in f32)."""
    w_ih, w_hh, b_ih, b_hh, w_lin, b_lin = raw
    # 0.5 pre-scale of i/f/o gate columns (power-of-two scale: exact in f32).
    col_scale = jnp.concatenate([
        jnp.full((2 * HID,), 0.5, jnp.float32),   # i, f
        jnp.ones((HID,), jnp.float32),            # g
        jnp.full((HID,), 0.5, jnp.float32),       # o
    ])
    wih_pre = w_ih.T * col_scale[None, :]                      # (1, 4H)
    bias_pre = ((b_ih + b_hh) * col_scale)[None, :]            # (1, 4H)
    whh_pre = w_hh.T * col_scale[None, :]                      # (H, 4H)
    wlin_t = w_lin.T                                           # (SEQ*H, 2)

    # Fuse wlin's t=0 columns into the recurrent matmul; zero-pad N to a lane
    # multiple (free on the MXU: same number of N tiles on all generations).
    whh_fused = jnp.zeros((HID, NF), jnp.float32)
    whh_fused = whh_fused.at[:, :4 * HID].set(whh_pre)
    whh_fused = whh_fused.at[:, 4 * HID:4 * HID + 2].set(wlin_t[:HID, :])
    wlin1 = wlin_t[HID:2 * HID, :]                             # (H, 2)
    return (wih_pre, bias_pre, whh_fused, wlin1, b_lin[None, :])


def init_params(key):
    """Deterministic synthetic params with PyTorch LSTM/Linear shapes."""
    k = jax.random.split(key, 6)
    scale = 1.0 / jnp.sqrt(HID)
    # PyTorch shapes: weight_ih_l0 (4H, 1), weight_hh_l0 (4H, H), biases (4H,)
    w_ih = jax.random.uniform(k[0], (4 * HID, 1), jnp.float32, -scale, scale)
    w_hh = jax.random.uniform(k[1], (4 * HID, HID), jnp.float32, -scale, scale)
    b_ih = jax.random.uniform(k[2], (4 * HID,), jnp.float32, -scale, scale)
    b_hh = jax.random.uniform(k[3], (4 * HID,), jnp.float32, -scale, scale)
    # Linear: weight (2, 32*seq), bias (2,)
    lscale = 1.0 / jnp.sqrt(HID * SEQ)
    w_lin = jax.random.uniform(k[4], (2, HID * SEQ), jnp.float32, -lscale, lscale)
    b_lin = jax.random.uniform(k[5], (2,), jnp.float32, -lscale, lscale)
    raw = (w_ih, w_hh, b_ih, b_hh, w_lin, b_lin)
    return prepare_kernel_params(raw), raw


def reference_forward(x, raw):
    """Pure-JAX reference mirroring torch.nn.LSTM + Linear semantics."""
    w_ih, w_hh, b_ih, b_hh, w_lin, b_lin = raw
    B = x.shape[0]
    h = jnp.zeros((B, HID), jnp.float32)
    c = jnp.zeros((B, HID), jnp.float32)
    outs = []
    for t in range(SEQ):
        x_t = x[:, t, :]  # (B, 1)
        gates = x_t @ w_ih.T + h @ w_hh.T + b_ih + b_hh
        i_g = jax.nn.sigmoid(gates[:, 0 * HID:1 * HID])
        f_g = jax.nn.sigmoid(gates[:, 1 * HID:2 * HID])
        g_g = jnp.tanh(gates[:, 2 * HID:3 * HID])
        o_g = jax.nn.sigmoid(gates[:, 3 * HID:4 * HID])
        c = f_g * c + i_g * g_g
        h = o_g * jnp.tanh(c)
        outs.append(h)
    h_cat = jnp.concatenate(outs, axis=-1)
    return h_cat @ w_lin.T + b_lin


if __name__ == "__main__":
    key = jax.random.PRNGKey(0)
    kx, kp = jax.random.split(key)
    kparams, raw = init_params(kp)

    # Small demo batch (pads 4 -> 8 rows, single grid step).
    B = 4
    x = jax.random.normal(kx, (B, SEQ, 1), jnp.float32)
    out = net_forward(x, kparams)
    jax.block_until_ready(out)
    ref = reference_forward(x, raw)
    assert out.shape == (B, 2)
    assert jnp.allclose(out, ref, atol=1e-5, rtol=1e-5), (out, ref)

    # Exercise the multi-block grid + tail padding path (B=20, TB=8 -> grid=(3,)).
    B2 = 20
    x2 = jax.random.normal(jax.random.PRNGKey(1), (B2, SEQ, 1), jnp.float32)
    out2 = net_forward(x2, kparams, batch_tile=8)
    jax.block_until_ready(out2)
    ref2 = reference_forward(x2, raw)
    assert out2.shape == (B2, 2)
    assert jnp.allclose(out2, ref2, atol=1e-5, rtol=1e-5), (out2, ref2)

    print("KERNEL_OK")
</pallas_src>

<mosaic_0001>
module attributes {stable_mosaic.version = 11 : i64} {
  func.func @lstm_linear_kernel(%arg0: i32, %arg1: memref<8x2xf32, #tpu.memory_space<vmem>>, %arg2: memref<1x128xf32, #tpu.memory_space<vmem>>, %arg3: memref<1x128xf32, #tpu.memory_space<vmem>>, %arg4: memref<32x256xf32, #tpu.memory_space<vmem>>, %arg5: memref<32x2xf32, #tpu.memory_space<vmem>>, %arg6: memref<1x2xf32, #tpu.memory_space<vmem>>, %arg7: memref<8x2xf32, #tpu.memory_space<vmem>>) attributes {dimension_semantics = [#tpu.dimension_semantics<parallel>], iteration_bounds = array<i64: 1>, scalar_prefetch = 0 : i64, scratch_operands = 0 : i64, tpu.core_type = #tpu.core_type<tc>, window_params = [{transform_indices = @transform_0, window_bounds = array<i64: 8, 2>}, {pipeline_mode = #tpu.pipeline_mode<synchronous>, transform_indices = @transform_1, window_bounds = array<i64: 1, 128>}, {pipeline_mode = #tpu.pipeline_mode<synchronous>, transform_indices = @transform_2, window_bounds = array<i64: 1, 128>}, {pipeline_mode = #tpu.pipeline_mode<synchronous>, transform_indices = @transform_3, window_bounds = array<i64: 32, 256>}, {pipeline_mode = #tpu.pipeline_mode<synchronous>, transform_indices = @transform_4, window_bounds = array<i64: 32, 2>}, {pipeline_mode = #tpu.pipeline_mode<synchronous>, transform_indices = @transform_5, window_bounds = array<i64: 1, 2>}, {transform_indices = @transform_6, window_bounds = array<i64: 8, 2>}]} {
    %c0 = arith.constant 0 : index
    %c0_0 = arith.constant 0 : index
    %0 = vector.load %arg1[%c0, %c0_0] : memref<8x2xf32, #tpu.memory_space<vmem>>, vector<8x2xf32>
    %c0_1 = arith.constant 0 : index
    %c0_2 = arith.constant 0 : index
    %1 = vector.load %arg2[%c0_1, %c0_2] : memref<1x128xf32, #tpu.memory_space<vmem>>, vector<1x128xf32>
    %c0_3 = arith.constant 0 : index
    %c0_4 = arith.constant 0 : index
    %2 = vector.load %arg3[%c0_3, %c0_4] : memref<1x128xf32, #tpu.memory_space<vmem>>, vector<1x128xf32>
    %c0_5 = arith.constant 0 : index
    %c0_6 = arith.constant 0 : index
    %3 = vector.load %arg4[%c0_5, %c0_6] : memref<32x256xf32, #tpu.memory_space<vmem>>, vector<32x256xf32>
    %c0_7 = arith.constant 0 : index
    %c0_8 = arith.constant 0 : index
    %4 = vector.load %arg5[%c0_7, %c0_8] : memref<32x2xf32, #tpu.memory_space<vmem>>, vector<32x2xf32>
    %5 = tpu.iota {dimensions = array<i32: 1>} : vector<1x128xi32>
    %c64_i32 = arith.constant 64 : i32
    %6 = vector.broadcast %c64_i32 : i32 to vector<1x128xi32>
    %7 = arith.cmpi sge, %5, %6 : vector<1x128xi32>
    %c96_i32 = arith.constant 96 : i32
    %8 = vector.broadcast %c96_i32 : i32 to vector<1x128xi32>
    %9 = arith.cmpi slt, %5, %8 : vector<1x128xi32>
    %10 = arith.andi %7, %9 : vector<1x128xi1>
    %cst = arith.constant 1.000000e+00 : f32
    %cst_9 = arith.constant 5.000000e-01 : f32
    %11 = vector.broadcast %cst : f32 to vector<1x128xf32>
    %12 = vector.broadcast %cst_9 : f32 to vector<1x128xf32>
    %13 = arith.select %10, %11, %12 : vector<1x128xi1>, vector<1x128xf32>
    %cst_10 = arith.constant 0.000000e+00 : f32
    %cst_11 = arith.constant 5.000000e-01 : f32
    %14 = vector.broadcast %cst_10 : f32 to vector<1x128xf32>
    %15 = vector.broadcast %cst_11 : f32 to vector<1x128xf32>
    %16 = arith.select %10, %14, %15 : vector<1x128xi1>, vector<1x128xf32>
    %17 = vector.extract_strided_slice %0 {offsets = [0, 0], sizes = [8, 1], strides = [1, 1]} : vector<8x2xf32> to vector<8x1xf32>
    %18 = vector.broadcast %17 : vector<8x1xf32> to vector<8x128xf32>
    %19 = vector.broadcast %1 : vector<1x128xf32> to vector<8x128xf32>
    %20 = arith.mulf %18, %19 : vector<8x128xf32>
    %21 = vector.broadcast %2 : vector<1x128xf32> to vector<8x128xf32>
    %22 = arith.addf %20, %21 : vector<8x128xf32>
    %23 = math.tanh %22 : vector<8x128xf32>
    %24 = vector.broadcast %13 : vector<1x128xf32> to vector<8x128xf32>
    %25 = arith.mulf %23, %24 : vector<8x128xf32>
    %26 = vector.broadcast %16 : vector<1x128xf32> to vector<8x128xf32>
    %27 = arith.addf %25, %26 : vector<8x128xf32>
    %28 = vector.extract_strided_slice %27 {offsets = [0, 0], sizes = [8, 32], strides = [1, 1]} : vector<8x128xf32> to vector<8x32xf32>
    %29 = vector.extract_strided_slice %27 {offsets = [0, 64], sizes = [8, 32], strides = [1, 1]} : vector<8x128xf32> to vector<8x32xf32>
    %30 = vector.extract_strided_slice %27 {offsets = [0, 96], sizes = [8, 32], strides = [1, 1]} : vector<8x128xf32> to vector<8x32xf32>
    %31 = arith.mulf %28, %29 : vector<8x32xf32>
    %32 = math.tanh %31 : vector<8x32xf32>
    %33 = arith.mulf %30, %32 : vector<8x32xf32>
    %cst_12 = arith.constant dense<0.000000e+00> : vector<8x256xf32>
    %34 = tpu.matmul %33, %3, %cst_12 {dimension_numbers = #tpu.dot_dimension_numbers<[1], [0], [0], [1], [0, 0, 1, 1], [], []>} : vector<8x32xf32>, vector<32x256xf32>, vector<8x256xf32> -> vector<8x256xf32>
    %35 = vector.extract_strided_slice %0 {offsets = [0, 1], sizes = [8, 1], strides = [1, 1]} : vector<8x2xf32> to vector<8x1xf32>
    %36 = vector.broadcast %35 : vector<8x1xf32> to vector<8x128xf32>
    %37 = vector.broadcast %1 : vector<1x128xf32> to vector<8x128xf32>
    %38 = arith.mulf %36, %37 : vector<8x128xf32>
    %39 = vector.extract_strided_slice %34 {offsets = [0, 0], sizes = [8, 128], strides = [1, 1]} : vector<8x256xf32> to vector<8x128xf32>
    %40 = arith.addf %38, %39 : vector<8x128xf32>
    %41 = vector.broadcast %2 : vector<1x128xf32> to vector<8x128xf32>
    %42 = arith.addf %40, %41 : vector<8x128xf32>
    %43 = math.tanh %42 : vector<8x128xf32>
    %44 = vector.broadcast %13 : vector<1x128xf32> to vector<8x128xf32>
    %45 = arith.mulf %43, %44 : vector<8x128xf32>
    %46 = vector.broadcast %16 : vector<1x128xf32> to vector<8x128xf32>
    %47 = arith.addf %45, %46 : vector<8x128xf32>
    %48 = vector.extract_strided_slice %47 {offsets = [0, 0], sizes = [8, 32], strides = [1, 1]} : vector<8x128xf32> to vector<8x32xf32>
    %49 = vector.extract_strided_slice %47 {offsets = [0, 32], sizes = [8, 32], strides = [1, 1]} : vector<8x128xf32> to vector<8x32xf32>
    %50 = vector.extract_strided_slice %47 {offsets = [0, 64], sizes = [8, 32], strides = [1, 1]} : vector<8x128xf32> to vector<8x32xf32>
    %51 = vector.extract_strided_slice %47 {offsets = [0, 96], sizes = [8, 32], strides = [1, 1]} : vector<8x128xf32> to vector<8x32xf32>
    %52 = arith.mulf %49, %31 : vector<8x32xf32>
    %53 = arith.mulf %48, %50 : vector<8x32xf32>
    %54 = arith.addf %52, %53 : vector<8x32xf32>
    %55 = math.tanh %54 : vector<8x32xf32>
    %56 = arith.mulf %51, %55 : vector<8x32xf32>
    %57 = vector.extract_strided_slice %34 {offsets = [0, 128], sizes = [8, 2], strides = [1, 1]} : vector<8x256xf32> to vector<8x2xf32>
    %cst_13 = arith.constant dense<0.000000e+00> : vector<8x2xf32>
    %58 = tpu.matmul %56, %4, %cst_13 {dimension_numbers = #tpu.dot_dimension_numbers<[1], [0], [0], [1], [0, 0, 1, 1], [], []>} : vector<8x32xf32>, vector<32x2xf32>, vector<8x2xf32> -> vector<8x2xf32>
    %59 = arith.addf %57, %58 : vector<8x2xf32>
    %c0_14 = arith.constant 0 : index
    %c0_15 = arith.constant 0 : index
    %60 = vector.load %arg6[%c0_14, %c0_15] : memref<1x2xf32, #tpu.memory_space<vmem>>, vector<1x2xf32>
    %61 = vector.broadcast %60 : vector<1x2xf32> to vector<8x2xf32>
    %62 = arith.addf %59, %61 : vector<8x2xf32>
    %c0_16 = arith.constant 0 : index
    %c0_17 = arith.constant 0 : index
    %63 = vector.load %arg7[%c0_16, %c0_17] : memref<8x2xf32, #tpu.memory_space<vmem>>, vector<8x2xf32>
    tpu.vector_store %arg7[%c0_16, %c0_17], %62 {strides = array<i32>} : memref<8x2xf32, #tpu.memory_space<vmem>>, vector<8x2xf32>,
    return
  }
  func.func @transform_0(%arg0: i32) -> (i32, i32) {
    %c0_i32 = arith.constant 0 : i32
    %c0_i32_0 = arith.constant 0 : i32
    return %arg0, %c0_i32 : i32, i32
  }
  func.func @transform_1(%arg0: i32) -> (i32, i32) {
    %c0_i32 = arith.constant 0 : i32
    %c0_i32_0 = arith.constant 0 : i32
    %c0_i32_1 = arith.constant 0 : i32
    return %c0_i32, %c0_i32_0 : i32, i32
  }
  func.func @transform_2(%arg0: i32) -> (i32, i32) {
    %c0_i32 = arith.constant 0 : i32
    %c0_i32_0 = arith.constant 0 : i32
    %c0_i32_1 = arith.constant 0 : i32
    return %c0_i32, %c0_i32_0 : i32, i32
  }
  func.func @transform_3(%arg0: i32) -> (i32, i32) {
    %c0_i32 = arith.constant 0 : i32
    %c0_i32_0 = arith.constant 0 : i32
    %c0_i32_1 = arith.constant 0 : i32
    return %c0_i32, %c0_i32_0 : i32, i32
  }
  func.func @transform_4(%arg0: i32) -> (i32, i32) {
    %c0_i32 = arith.constant 0 : i32
    %c0_i32_0 = arith.constant 0 : i32
    %c0_i32_1 = arith.constant 0 : i32
    return %c0_i32, %c0_i32_0 : i32, i32
  }
  func.func @transform_5(%arg0: i32) -> (i32, i32) {
    %c0_i32 = arith.constant 0 : i32
    %c0_i32_0 = arith.constant 0 : i32
    %c0_i32_1 = arith.constant 0 : i32
    return %c0_i32, %c0_i32_0 : i32, i32
  }
  func.func @transform_6(%arg0: i32) -> (i32, i32) {
    %c0_i32 = arith.constant 0 : i32
    %c0_i32_0 = arith.constant 0 : i32
    return %arg0, %c0_i32 : i32, i32
  }
}

</mosaic_0001>

<bundles_post_ra>
// kernel: tpu_custom_call.1
= control target key start
LH: loop header
LB: loop body
LE: loop exit
PB: predicated region body
PF: predicated region fallthrough
CT: control target
= control target key end

     0   :  { %11 = vsyncpa [#allocation3], 0  ;;  %s255_s24 = smov [#allocation2]   ;;  %s256_s26 = smov 256   ;;  %s339_s0 = inlined_call_operand.vmem [shape: f32[8,2], index: 0, kind: input, shape index: {}]   ;;  %s340_s1 = inlined_call_operand.vmem [shape: f32[1,128], index: 1, kind: input, shape index: {}]   ;;  %s341_s2 = inlined_call_operand.vmem [shape: f32[1,128], index: 2, kind: input, shape index: {}]   ;;  %s342_s3 = inlined_call_operand.hbm [shape: f32[32,256], index: 3, kind: input, shape index: {}]   ;;  %s343_s4 = inlined_call_operand.vmem [shape: f32[32,2], index: 4, kind: input, shape index: {}]   ;;  %s344_s5 = inlined_call_operand.vmem [shape: f32[1,2], index: 5, kind: input, shape index: {}]   ;;  %s345_s6 = inlined_call_operand.vmem [shape: f32[8,2], index: 6, kind: output, shape index: {}]  }
   0x1   :  { %s22_s23 = sshll.u32 %s342_s3, 4  ;;  %s24_s25 = sshll.u32 %s255_s24, 4  ;;  %s23_s23 = int_to_ptr.hbm [resolvable:$true] %s22_s23  ;;  %s25_s25 = int_to_ptr.vmem [resolvable:$true] %s24_s25 }
   0x2   :  { %s257_s27 = smov 16  }
   0x3   :  { %30 = dma.hbm_to_vmem [thread:$0]  %s23_s23, 1024, %s25_s25, [#allocation3], %s256_s26, %s256_s26, %s257_s27  }
   0x4   :  { %253 = dma.done.wait [#allocation3], 1024  }
   0x5   :  { %254 = vsyncadd [#allocation3], 4294966272  ;;  %v258_v0 = vmov 0   ;;  %v39_v1 = vld [vmem:[%s339_s0] sm:$0xff]  ;;  %v54_v2 = vlaneseq  ;;  %v259_v9 = vmov 0.5   ;;  %s260_s0 = smov 64  }
   0x6   :  { %215 = vset.pattern.permute.xlu0 %v258_v0  ;;  %v218_v3 = vld [vmem:[%s340_s1] ss:$0 sm:$0xff]  ;;  %s261_s1 = smov 32   ;;  %v48_v18 = vld [vmem:[#allocation2 + $0x30] sm:$0xff]  ;;  %v49_v19 = vld [vmem:[#allocation2 + $0x38] sm:$0xff]  ;;  %v263_v28 = vmov 1  }
   0x7   :  { %63 = vperm.xlu0 %215, %v39_v1   ;;  %v219_v4 = vld [vmem:[%s341_s2] ss:$0 sm:$0xff]  ;;  %v55_v5 = vand.u32 127, %v54_v2  ;;  %s262_s2 = smov 96   ;;  %106 = vmatpush.msra.mxu0 %v48_v18  ;;  %v47_v21 = vld [vmem:[#allocation2 + $0x28] sm:$0xff]  ;;  %v44_v22 = vld [vmem:[#allocation2 + $0x10] sm:$0xff] }
   0x8   :  { %v46_v20 = vld [vmem:[#allocation2 + $0x20] sm:$0xff]  ;;  %126 = vmatpush.msra.mxu1 %v49_v19  ;;  %v45_v23 = vld [vmem:[#allocation2 + $0x18] sm:$0xff]  ;;  %v43_v25 = vld [vmem:[#allocation2 + $0x8] sm:$0xff]  ;;  %216 = vset.pattern.permute.xlu2 %v263_v28  ;;  %vm91_vm3 = vcmask 261120   ;;  %vm196_vm4 = vcmask 15360  }
   0x9   :  { %vm56_vm0 = vcmp.ge.s32.totalorder %v55_v5, 64  ;;  %vm57_vm1 = vcmp.lt.s32.totalorder %v55_v5, 96  ;;  %107 = vmatpush.msra.mxu0 %v46_v20  ;;  %v42_v24 = vld [vmem:[#allocation2] sm:$0xff]  ;;  %135 = vperm.xlu2 %216, %v39_v1   ;;  %v53_v45 = vld [vmem:[%s343_s4 + $0x18] sm:$0xff]  ;;  %v52_v46 = vld [vmem:[%s343_s4 + $0x10] sm:$0xff] }
   0xa   :  { %vm58_vm2 = vmand %vm56_vm0, %vm57_vm1  ;;  %127 = vmatpush.msra.mxu1 %v47_v21  ;;  %182 = vmatpush.msra.mxu2 %v53_v45  ;;  %v51_v47 = vld [vmem:[%s343_s4 + $0x8] sm:$0xff]  ;;  %v50_v48 = vld [vmem:[%s343_s4] sm:$0xff] }
   0xb   :  { %v59_v10 = vsel %vm58_vm2, 1.0, %v259_v9  ;;  %v60_v12 = vsel %vm58_vm2, 0.0, %v259_v9  ;;  %108 = vmatpush.msra.mxu0 %v44_v22  ;;  %v220_v52 = vld [vmem:[%s344_s5] ss:$0 sm:$0xff] }
   0xc   :  { %128 = vmatpush.msra.mxu1 %v45_v23  ;;  %183 = vmatpush.msra.mxu2 %v52_v46 }
   0xd   :  { %109 = vmatpush.msra.mxu0 %v42_v24 }
   0xe   :  { %129 = vmatpush.msra.mxu1 %v43_v25  ;;  %184 = vmatpush.msra.mxu2 %v51_v47 }
   0xf   :  { %217 = vset.pattern.permute.xlu0 %v263_v28 }
  0x10   :  { %185 = vmatpush.msra.mxu2 %v50_v48 }
  0x63   :  { %v136_v30 = vpop.permute.xlu2 %135 }
  0x64   :  { %v138_v31 = vmul.f32 %v218_v3, %v136_v30 }
  0x79   :  { %v64_v6 = vpop.permute.xlu0 %63 }
  0x7a   :  { %v69_v7 = vmul.f32 %v218_v3, %v64_v6 }
  0x7c   :  { %v73_v8 = vadd.f32 %v219_v4, %v69_v7 }
  0x7e   :  { %221 = vtanh.f32 %v73_v8 }
  0x84   :  { %v222_v11 = vpop.eup %221 }
  0x85   :  { %v75_v13 = vmul.f32 %v222_v11, %v59_v10 }
  0x87   :  { %v76_v14 = vadd.f32 %v75_v13, %v60_v12 }
  0x89   :  { %78 = vrot.lane.b32.xlu0 %v76_v14, %s260_s0 }
  0xfb   :  { %v79_v15 = vpop.permute.xlu0 %78 }
  0xfc   :  { %v81_v16 = vmul.f32 %v79_v15, %v76_v14 }
  0xfe   :  { %223 = vtanh.f32 %v81_v16  ;;  %145 = vrot.lane.b32.xlu0 %v81_v16, %s261_s1 }
 0x104   :  { %v224_v17 = vpop.eup %223 }
 0x105   :  { %84 = vrot.lane.b32.xlu1 %v224_v17, %s262_s2 }
 0x170   :  { %v146_v40 = vpop.permute.xlu0 %145 }
 0x177   :  { %v85_v26 = vpop.permute.xlu1 %84 }
 0x178   :  { %v87_v27 = vmul.f32 %v85_v26, %v76_v14 }
 0x17a   :  { %89 = vrot.lane.b32.xlu1 %v87_v27, %s261_s1 }
 0x1ec   :  { %v90_v29 = vpop.permute.xlu1 %89 }
 0x1ed   :  { %203 = vmatmul.msk.f32.vlgmr.msra.gmra.mxu0 %vm91_vm3, %v90_v29  ;;  %204 = vmatmul.msk.f32.vlgmr.msra.gmra.mxu1 %vm91_vm3, %v90_v29 }
 0x26a   :  { %v111_v32 = vpop.f32.mrf.mxu0  ;;  %v131_v53 = vpop.f32.mrf.mxu1 }
 0x26b   :  { %v139_v33 = vadd.f32 %v138_v31, %v111_v32 }
 0x26d   :  { %v140_v34 = vadd.f32 %v219_v4, %v139_v33 }
 0x26f   :  { %225 = vtanh.f32 %v140_v34 }
 0x275   :  { %v226_v35 = vpop.eup %225 }
 0x276   :  { %v142_v36 = vmul.f32 %v226_v35, %v59_v10 }
 0x278   :  { %v143_v37 = vadd.f32 %v142_v36, %v60_v12 }
 0x27a   :  { %150 = vrot.lane.b32.xlu2 %v143_v37, %s260_s0  ;;  %v148_v41 = vmul.f32 %v146_v40, %v143_v37 }
 0x2d4   :  { %v151_v38 = vpop.permute.xlu2 %150 }
 0x2d5   :  { %v153_v39 = vmul.f32 %v151_v38, %v143_v37 }
 0x2d7   :  { %155 = vrot.lane.b32.xlu1 %v153_v39, %s261_s1 }
 0x349   :  { %v156_v42 = vpop.permute.xlu1 %155 }
 0x34a   :  { %v158_v43 = vadd.f32 %v156_v42, %v148_v41 }
 0x34c   :  { %227 = vtanh.f32 %v158_v43 }
 0x352   :  { %v228_v44 = vpop.eup %227 }
 0x353   :  { %161 = vrot.lane.b32.xlu2 %v228_v44, %s260_s0 }
 0x3ad   :  { %v162_v49 = vpop.permute.xlu2 %161 }
 0x3ae   :  { %v164_v50 = vmul.f32 %v162_v49, %v143_v37 }
 0x3b0   :  { %166 = vrot.lane.b32.xlu0 %v164_v50, %s261_s1 }
 0x422   :  { %v167_v51 = vpop.permute.xlu0 %166 }
 0x423   :  { %205 = vmatmul.msk.f32.vlgmr.msra.gmra.mxu2 %vm91_vm3, %v167_v51 }
 0x4a6   :  { %v187_v54 = vpop.f32.mrf.mxu2 }
 0x4a7   :  { %v190_v55 = vadd.f32 %v187_v54, %v131_v53 }
 0x4a9   :  { %v195_v56 = vadd.f32 %v220_v52, %v190_v55 }
 0x4ab   :  { %197 = vst.msk [vmem:[%s345_s6] sm:$0xff] %vm196_vm4, %v195_v56 }
 0x4ac   :  { %202 = vsyncpa [#allocation3], 1 }

</bundles_post_ra>
